<compile_context>
chip_gen: v6e
topology: v6e:2x2x1
jax: 0.10.0
libtpu: 0.0.40
codegen_flags: <defaults>
</compile_context>

<pallas_src>
import math

import jax
import jax.numpy as jnp
from jax.experimental import pallas as pl
from jax.experimental.pallas import tpu as pltpu

# ---- model hyper-parameters (small, consistent with the module) ----
B = 2          # batch
S = 8          # sequence length
D_MODEL = 32
D_K = 16
D_V = 16
N_HEADS = 4
LN_EPS = 1e-5
BS = B * S

NEG_MASK = -1e9     # matches torch masked_fill_(-1000000000.0)
NEG_XBATCH = -2e9   # cross-batch blocker for the flattened (B*S, B*S) attention


# ----------------------------------------------------------------------------
# Pallas kernel: fused MHA + residual + LayerNorm, single block, no grid
# ----------------------------------------------------------------------------
def mha_kernel(q_in_ref, k_in_ref, v_in_ref, bias_ref,
               wq_ref, bq_ref, wk_ref, bk_ref, wv_ref, bv_ref,
               wo_ref, bo_ref, gamma_ref, beta_ref,
               out_ref):
    x_q = q_in_ref[...]                               # (BS, D_MODEL), residual source

    # QKV projections on the flattened (B*S) LHS.
    # The 1/sqrt(d_k) scale is already folded into wq/bq by the wrapper.
    q = jnp.dot(x_q, wq_ref[...], preferred_element_type=jnp.float32) + bq_ref[...]
    k = jnp.dot(k_in_ref[...], wk_ref[...], preferred_element_type=jnp.float32) + bk_ref[...]
    v = jnp.dot(v_in_ref[...], wv_ref[...], preferred_element_type=jnp.float32) + bv_ref[...]

    bias = bias_ref[...]                              # (BS, BS) additive mask bias
    wo = wo_ref[...]                                  # (N_HEADS*D_V, D_MODEL)

    # Accumulate the output projection head-by-head:
    #   context @ W_O == sum_h ctx_h @ W_O[h*d_v:(h+1)*d_v, :]
    # This removes the per-head lane concatenate entirely.
    acc = x_q + bo_ref[...]                           # residual + fc bias
    for h in range(N_HEADS):                          # static unroll, N_HEADS = 4
        qh = q[:, h * D_K:(h + 1) * D_K]              # (BS, D_K)
        kh = k[:, h * D_K:(h + 1) * D_K]              # (BS, D_K)
        vh = v[:, h * D_V:(h + 1) * D_V]              # (BS, D_V)

        # scores = qh @ kh^T  (scale pre-folded) + additive mask bias
        s = jax.lax.dot_general(qh, kh, (((1,), (1,)), ((), ())),
                                preferred_element_type=jnp.float32) + bias
        s = s - jnp.max(s, axis=-1, keepdims=True)
        p = jnp.exp(s)
        p = p * pl.reciprocal(jnp.sum(p, axis=-1, keepdims=True), approx=True)

        ctx = jnp.dot(p, vh, preferred_element_type=jnp.float32)          # (BS, D_V)
        acc = acc + jnp.dot(ctx, wo[h * D_V:(h + 1) * D_V, :],
                            preferred_element_type=jnp.float32)

    # Fused LayerNorm epilogue
    mean = jnp.mean(acc, axis=-1, keepdims=True)
    var = jnp.mean((acc - mean) ** 2, axis=-1, keepdims=True)
    out_ref[...] = (acc - mean) * jax.lax.rsqrt(var + LN_EPS) * gamma_ref[...] + beta_ref[...]


# ----------------------------------------------------------------------------
# Wrapper
# ----------------------------------------------------------------------------
@jax.jit
def mha_forward(q_in, k_in, v_in, attn_mask, p):
    scale = 1.0 / math.sqrt(D_K)
    wq_s = p["wq"] * scale            # fold 1/sqrt(d_k) into the Q projection
    bq_s = p["bq"] * scale

    # Additive mask bias, block-diagonal over batch so attention over the
    # flattened (B*S) axis stays strictly within each batch element.
    bias_b = jnp.where(attn_mask, jnp.float32(NEG_MASK), jnp.float32(0.0))   # (B,S,S)
    bias_full = jnp.full((B, S, B, S), jnp.float32(NEG_XBATCH))
    bias_full = bias_full.at[jnp.arange(B), :, jnp.arange(B), :].set(bias_b)
    bias_full = bias_full.reshape(BS, BS)

    vmem = pl.BlockSpec(memory_space=pltpu.MemorySpace.VMEM)
    out2d = pl.pallas_call(
        mha_kernel,
        out_shape=jax.ShapeDtypeStruct((BS, D_MODEL), jnp.float32),
        in_specs=[vmem] * 14,
        out_specs=vmem,
    )(q_in.reshape(BS, D_MODEL), k_in.reshape(BS, D_MODEL),
      v_in.reshape(BS, D_MODEL), bias_full,
      wq_s, bq_s, p["wk"], p["bk"], p["wv"], p["bv"],
      p["wo"], p["bo"], p["ln_g"], p["ln_b"])
    return out2d.reshape(B, S, D_MODEL)


# ----------------------------------------------------------------------------
# Pure-JAX reference (mirrors the PyTorch module)
# ----------------------------------------------------------------------------
def mha_ref(q_in, k_in, v_in, attn_mask, p):
    q = (q_in @ p["wq"] + p["bq"]).reshape(B, S, N_HEADS, D_K).transpose(0, 2, 1, 3)
    k = (k_in @ p["wk"] + p["bk"]).reshape(B, S, N_HEADS, D_K).transpose(0, 2, 1, 3)
    v = (v_in @ p["wv"] + p["bv"]).reshape(B, S, N_HEADS, D_V).transpose(0, 2, 1, 3)
    scores = jnp.einsum("bhqd,bhkd->bhqk", q, k) / math.sqrt(D_K)
    scores = jnp.where(attn_mask[:, None, :, :], NEG_MASK, scores)
    attn = jax.nn.softmax(scores, axis=-1)
    ctx = jnp.einsum("bhqk,bhkd->bhqd", attn, v)
    ctx = ctx.transpose(0, 2, 1, 3).reshape(B, S, N_HEADS * D_V)
    y = ctx @ p["wo"] + p["bo"] + q_in
    mean = jnp.mean(y, axis=-1, keepdims=True)
    var = jnp.mean((y - mean) ** 2, axis=-1, keepdims=True)
    return (y - mean) / jnp.sqrt(var + LN_EPS) * p["ln_g"] + p["ln_b"]


# ----------------------------------------------------------------------------
# Main
# ----------------------------------------------------------------------------
if __name__ == "__main__":
    key = jax.random.PRNGKey(0)
    ks = jax.random.split(key, 12)

    def init(k, shape, fan_in):
        bound = 1.0 / math.sqrt(fan_in)
        return jax.random.uniform(k, shape, jnp.float32, -bound, bound)

    params = {
        "wq": init(ks[0], (D_MODEL, N_HEADS * D_K), D_MODEL),
        "bq": init(ks[1], (1, N_HEADS * D_K), D_MODEL),
        "wk": init(ks[2], (D_MODEL, N_HEADS * D_K), D_MODEL),
        "bk": init(ks[3], (1, N_HEADS * D_K), D_MODEL),
        "wv": init(ks[4], (D_MODEL, N_HEADS * D_V), D_MODEL),
        "bv": init(ks[5], (1, N_HEADS * D_V), D_MODEL),
        "wo": init(ks[6], (N_HEADS * D_V, D_MODEL), N_HEADS * D_V),
        "bo": init(ks[7], (1, D_MODEL), N_HEADS * D_V),
        "ln_g": jnp.ones((1, D_MODEL), jnp.float32),
        "ln_b": jnp.zeros((1, D_MODEL), jnp.float32),
    }

    q_in = jax.random.normal(ks[8], (B, S, D_MODEL), jnp.float32)
    k_in = jax.random.normal(ks[9], (B, S, D_MODEL), jnp.float32)
    v_in = jax.random.normal(ks[10], (B, S, D_MODEL), jnp.float32)

    # padding-style mask: last 2 key positions masked for batch 1 (True = masked)
    valid_len = jnp.array([S, S - 2], jnp.int32)
    key_pos = jnp.arange(S)[None, None, :]                       # (1, 1, S)
    attn_mask = jnp.broadcast_to(key_pos >= valid_len[:, None, None], (B, S, S))

    out = mha_forward(q_in, k_in, v_in, attn_mask, params)
    out = jax.block_until_ready(out)

    ref = mha_ref(q_in, k_in, v_in, attn_mask, params)
    assert out.shape == (B, S, D_MODEL)
    # 2e-3 tolerance: softmax denominator uses the EUP approximate reciprocal.
    assert jnp.allclose(out, ref, atol=2e-3, rtol=2e-3), "mismatch vs JAX reference"

    print("KERNEL_OK")
</pallas_src>

<mosaic_0001>
module attributes {stable_mosaic.version = 11 : i64} {
  func.func @mha_kernel(%arg0: memref<16x32xf32, #tpu.memory_space<vmem>>, %arg1: memref<16x32xf32, #tpu.memory_space<vmem>>, %arg2: memref<16x32xf32, #tpu.memory_space<vmem>>, %arg3: memref<16x16xf32, #tpu.memory_space<vmem>>, %arg4: memref<32x64xf32, #tpu.memory_space<vmem>>, %arg5: memref<1x64xf32, #tpu.memory_space<vmem>>, %arg6: memref<32x64xf32, #tpu.memory_space<vmem>>, %arg7: memref<1x64xf32, #tpu.memory_space<vmem>>, %arg8: memref<32x64xf32, #tpu.memory_space<vmem>>, %arg9: memref<1x64xf32, #tpu.memory_space<vmem>>, %arg10: memref<64x32xf32, #tpu.memory_space<vmem>>, %arg11: memref<1x32xf32, #tpu.memory_space<vmem>>, %arg12: memref<1x32xf32, #tpu.memory_space<vmem>>, %arg13: memref<1x32xf32, #tpu.memory_space<vmem>>, %arg14: memref<16x32xf32, #tpu.memory_space<vmem>>) attributes {dimension_semantics = [], scalar_prefetch = 0 : i64, scratch_operands = 0 : i64, tpu.core_type = #tpu.core_type<tc>} {
    %c0 = arith.constant 0 : index
    %c0_0 = arith.constant 0 : index
    %0 = vector.load %arg0[%c0, %c0_0] : memref<16x32xf32, #tpu.memory_space<vmem>>, vector<16x32xf32>
    %c0_1 = arith.constant 0 : index
    %c0_2 = arith.constant 0 : index
    %1 = vector.load %arg4[%c0_1, %c0_2] : memref<32x64xf32, #tpu.memory_space<vmem>>, vector<32x64xf32>
    %cst = arith.constant dense<0.000000e+00> : vector<16x64xf32>
    %2 = tpu.matmul %0, %1, %cst {dimension_numbers = #tpu.dot_dimension_numbers<[1], [0], [0], [1], [0, 0, 1, 1], [], []>} : vector<16x32xf32>, vector<32x64xf32>, vector<16x64xf32> -> vector<16x64xf32>
    %c0_3 = arith.constant 0 : index
    %c0_4 = arith.constant 0 : index
    %3 = vector.load %arg5[%c0_3, %c0_4] : memref<1x64xf32, #tpu.memory_space<vmem>>, vector<1x64xf32>
    %4 = vector.broadcast %3 : vector<1x64xf32> to vector<16x64xf32>
    %5 = arith.addf %2, %4 : vector<16x64xf32>
    %c0_5 = arith.constant 0 : index
    %c0_6 = arith.constant 0 : index
    %6 = vector.load %arg1[%c0_5, %c0_6] : memref<16x32xf32, #tpu.memory_space<vmem>>, vector<16x32xf32>
    %c0_7 = arith.constant 0 : index
    %c0_8 = arith.constant 0 : index
    %7 = vector.load %arg6[%c0_7, %c0_8] : memref<32x64xf32, #tpu.memory_space<vmem>>, vector<32x64xf32>
    %cst_9 = arith.constant dense<0.000000e+00> : vector<16x64xf32>
    %8 = tpu.matmul %6, %7, %cst_9 {dimension_numbers = #tpu.dot_dimension_numbers<[1], [0], [0], [1], [0, 0, 1, 1], [], []>} : vector<16x32xf32>, vector<32x64xf32>, vector<16x64xf32> -> vector<16x64xf32>
    %c0_10 = arith.constant 0 : index
    %c0_11 = arith.constant 0 : index
    %9 = vector.load %arg7[%c0_10, %c0_11] : memref<1x64xf32, #tpu.memory_space<vmem>>, vector<1x64xf32>
    %10 = vector.broadcast %9 : vector<1x64xf32> to vector<16x64xf32>
    %11 = arith.addf %8, %10 : vector<16x64xf32>
    %c0_12 = arith.constant 0 : index
    %c0_13 = arith.constant 0 : index
    %12 = vector.load %arg2[%c0_12, %c0_13] : memref<16x32xf32, #tpu.memory_space<vmem>>, vector<16x32xf32>
    %c0_14 = arith.constant 0 : index
    %c0_15 = arith.constant 0 : index
    %13 = vector.load %arg8[%c0_14, %c0_15] : memref<32x64xf32, #tpu.memory_space<vmem>>, vector<32x64xf32>
    %cst_16 = arith.constant dense<0.000000e+00> : vector<16x64xf32>
    %14 = tpu.matmul %12, %13, %cst_16 {dimension_numbers = #tpu.dot_dimension_numbers<[1], [0], [0], [1], [0, 0, 1, 1], [], []>} : vector<16x32xf32>, vector<32x64xf32>, vector<16x64xf32> -> vector<16x64xf32>
    %c0_17 = arith.constant 0 : index
    %c0_18 = arith.constant 0 : index
    %15 = vector.load %arg9[%c0_17, %c0_18] : memref<1x64xf32, #tpu.memory_space<vmem>>, vector<1x64xf32>
    %16 = vector.broadcast %15 : vector<1x64xf32> to vector<16x64xf32>
    %17 = arith.addf %14, %16 : vector<16x64xf32>
    %c0_19 = arith.constant 0 : index
    %c0_20 = arith.constant 0 : index
    %18 = vector.load %arg3[%c0_19, %c0_20] : memref<16x16xf32, #tpu.memory_space<vmem>>, vector<16x16xf32>
    %c0_21 = arith.constant 0 : index
    %c0_22 = arith.constant 0 : index
    %19 = vector.load %arg10[%c0_21, %c0_22] : memref<64x32xf32, #tpu.memory_space<vmem>>, vector<64x32xf32>
    %c0_23 = arith.constant 0 : index
    %c0_24 = arith.constant 0 : index
    %20 = vector.load %arg11[%c0_23, %c0_24] : memref<1x32xf32, #tpu.memory_space<vmem>>, vector<1x32xf32>
    %21 = vector.broadcast %20 : vector<1x32xf32> to vector<16x32xf32>
    %22 = arith.addf %0, %21 : vector<16x32xf32>
    %23 = vector.extract_strided_slice %5 {offsets = [0, 0], sizes = [16, 16], strides = [1, 1]} : vector<16x64xf32> to vector<16x16xf32>
    %24 = vector.extract_strided_slice %11 {offsets = [0, 0], sizes = [16, 16], strides = [1, 1]} : vector<16x64xf32> to vector<16x16xf32>
    %25 = vector.extract_strided_slice %17 {offsets = [0, 0], sizes = [16, 16], strides = [1, 1]} : vector<16x64xf32> to vector<16x16xf32>
    %cst_25 = arith.constant dense<0.000000e+00> : vector<16x16xf32>
    %26 = tpu.matmul %23, %24, %cst_25 {dimension_numbers = #tpu.dot_dimension_numbers<[1], [1], [0], [0], [0, 0, 1, 0], [], []>} : vector<16x16xf32>, vector<16x16xf32>, vector<16x16xf32> -> vector<16x16xf32>
    %27 = arith.addf %26, %18 : vector<16x16xf32>
    %cst_26 = arith.constant dense<0xFF800000> : vector<16xf32>
    %28 = vector.multi_reduction <maximumf>, %27, %cst_26 [1] : vector<16x16xf32> to vector<16xf32>
    %29 = vector.shape_cast %28 : vector<16xf32> to vector<16x1xf32>
    %30 = vector.broadcast %29 : vector<16x1xf32> to vector<16x16xf32>
    %31 = arith.subf %27, %30 : vector<16x16xf32>
    %32 = math.exp %31 : vector<16x16xf32>
    %cst_27 = arith.constant dense<0.000000e+00> : vector<16xf32>
    %33 = vector.multi_reduction <add>, %32, %cst_27 [1] : vector<16x16xf32> to vector<16xf32>
    %34 = vector.shape_cast %33 : vector<16xf32> to vector<16x1xf32>
    %35 = tpu.reciprocal %34 {approx = true} : vector<16x1xf32> -> vector<16x1xf32>
    %36 = vector.broadcast %35 : vector<16x1xf32> to vector<16x16xf32>
    %37 = arith.mulf %32, %36 : vector<16x16xf32>
    %cst_28 = arith.constant dense<0.000000e+00> : vector<16x16xf32>
    %38 = tpu.matmul %37, %25, %cst_28 {dimension_numbers = #tpu.dot_dimension_numbers<[1], [0], [0], [1], [0, 0, 1, 1], [], []>} : vector<16x16xf32>, vector<16x16xf32>, vector<16x16xf32> -> vector<16x16xf32>
    %39 = vector.extract_strided_slice %19 {offsets = [0, 0], sizes = [16, 32], strides = [1, 1]} : vector<64x32xf32> to vector<16x32xf32>
    %cst_29 = arith.constant dense<0.000000e+00> : vector<16x32xf32>
    %40 = tpu.matmul %38, %39, %cst_29 {dimension_numbers = #tpu.dot_dimension_numbers<[1], [0], [0], [1], [0, 0, 1, 1], [], []>} : vector<16x16xf32>, vector<16x32xf32>, vector<16x32xf32> -> vector<16x32xf32>
    %41 = arith.addf %22, %40 : vector<16x32xf32>
    %42 = vector.extract_strided_slice %5 {offsets = [0, 16], sizes = [16, 16], strides = [1, 1]} : vector<16x64xf32> to vector<16x16xf32>
    %43 = vector.extract_strided_slice %11 {offsets = [0, 16], sizes = [16, 16], strides = [1, 1]} : vector<16x64xf32> to vector<16x16xf32>
    %44 = vector.extract_strided_slice %17 {offsets = [0, 16], sizes = [16, 16], strides = [1, 1]} : vector<16x64xf32> to vector<16x16xf32>
    %cst_30 = arith.constant dense<0.000000e+00> : vector<16x16xf32>
    %45 = tpu.matmul %42, %43, %cst_30 {dimension_numbers = #tpu.dot_dimension_numbers<[1], [1], [0], [0], [0, 0, 1, 0], [], []>} : vector<16x16xf32>, vector<16x16xf32>, vector<16x16xf32> -> vector<16x16xf32>
    %46 = arith.addf %45, %18 : vector<16x16xf32>
    %cst_31 = arith.constant dense<0xFF800000> : vector<16xf32>
    %47 = vector.multi_reduction <maximumf>, %46, %cst_31 [1] : vector<16x16xf32> to vector<16xf32>
    %48 = vector.shape_cast %47 : vector<16xf32> to vector<16x1xf32>
    %49 = vector.broadcast %48 : vector<16x1xf32> to vector<16x16xf32>
    %50 = arith.subf %46, %49 : vector<16x16xf32>
    %51 = math.exp %50 : vector<16x16xf32>
    %cst_32 = arith.constant dense<0.000000e+00> : vector<16xf32>
    %52 = vector.multi_reduction <add>, %51, %cst_32 [1] : vector<16x16xf32> to vector<16xf32>
    %53 = vector.shape_cast %52 : vector<16xf32> to vector<16x1xf32>
    %54 = tpu.reciprocal %53 {approx = true} : vector<16x1xf32> -> vector<16x1xf32>
    %55 = vector.broadcast %54 : vector<16x1xf32> to vector<16x16xf32>
    %56 = arith.mulf %51, %55 : vector<16x16xf32>
    %cst_33 = arith.constant dense<0.000000e+00> : vector<16x16xf32>
    %57 = tpu.matmul %56, %44, %cst_33 {dimension_numbers = #tpu.dot_dimension_numbers<[1], [0], [0], [1], [0, 0, 1, 1], [], []>} : vector<16x16xf32>, vector<16x16xf32>, vector<16x16xf32> -> vector<16x16xf32>
    %58 = vector.extract_strided_slice %19 {offsets = [16, 0], sizes = [16, 32], strides = [1, 1]} : vector<64x32xf32> to vector<16x32xf32>
    %cst_34 = arith.constant dense<0.000000e+00> : vector<16x32xf32>
    %59 = tpu.matmul %57, %58, %cst_34 {dimension_numbers = #tpu.dot_dimension_numbers<[1], [0], [0], [1], [0, 0, 1, 1], [], []>} : vector<16x16xf32>, vector<16x32xf32>, vector<16x32xf32> -> vector<16x32xf32>
    %60 = arith.addf %41, %59 : vector<16x32xf32>
    %61 = vector.extract_strided_slice %5 {offsets = [0, 32], sizes = [16, 16], strides = [1, 1]} : vector<16x64xf32> to vector<16x16xf32>
    %62 = vector.extract_strided_slice %11 {offsets = [0, 32], sizes = [16, 16], strides = [1, 1]} : vector<16x64xf32> to vector<16x16xf32>
    %63 = vector.extract_strided_slice %17 {offsets = [0, 32], sizes = [16, 16], strides = [1, 1]} : vector<16x64xf32> to vector<16x16xf32>
    %cst_35 = arith.constant dense<0.000000e+00> : vector<16x16xf32>
    %64 = tpu.matmul %61, %62, %cst_35 {dimension_numbers = #tpu.dot_dimension_numbers<[1], [1], [0], [0], [0, 0, 1, 0], [], []>} : vector<16x16xf32>, vector<16x16xf32>, vector<16x16xf32> -> vector<16x16xf32>
    %65 = arith.addf %64, %18 : vector<16x16xf32>
    %cst_36 = arith.constant dense<0xFF800000> : vector<16xf32>
    %66 = vector.multi_reduction <maximumf>, %65, %cst_36 [1] : vector<16x16xf32> to vector<16xf32>
    %67 = vector.shape_cast %66 : vector<16xf32> to vector<16x1xf32>
    %68 = vector.broadcast %67 : vector<16x1xf32> to vector<16x16xf32>
    %69 = arith.subf %65, %68 : vector<16x16xf32>
    %70 = math.exp %69 : vector<16x16xf32>
    %cst_37 = arith.constant dense<0.000000e+00> : vector<16xf32>
    %71 = vector.multi_reduction <add>, %70, %cst_37 [1] : vector<16x16xf32> to vector<16xf32>
    %72 = vector.shape_cast %71 : vector<16xf32> to vector<16x1xf32>
    %73 = tpu.reciprocal %72 {approx = true} : vector<16x1xf32> -> vector<16x1xf32>
    %74 = vector.broadcast %73 : vector<16x1xf32> to vector<16x16xf32>
    %75 = arith.mulf %70, %74 : vector<16x16xf32>
    %cst_38 = arith.constant dense<0.000000e+00> : vector<16x16xf32>
    %76 = tpu.matmul %75, %63, %cst_38 {dimension_numbers = #tpu.dot_dimension_numbers<[1], [0], [0], [1], [0, 0, 1, 1], [], []>} : vector<16x16xf32>, vector<16x16xf32>, vector<16x16xf32> -> vector<16x16xf32>
    %77 = vector.extract_strided_slice %19 {offsets = [32, 0], sizes = [16, 32], strides = [1, 1]} : vector<64x32xf32> to vector<16x32xf32>
    %cst_39 = arith.constant dense<0.000000e+00> : vector<16x32xf32>
    %78 = tpu.matmul %76, %77, %cst_39 {dimension_numbers = #tpu.dot_dimension_numbers<[1], [0], [0], [1], [0, 0, 1, 1], [], []>} : vector<16x16xf32>, vector<16x32xf32>, vector<16x32xf32> -> vector<16x32xf32>
    %79 = arith.addf %60, %78 : vector<16x32xf32>
    %80 = vector.extract_strided_slice %5 {offsets = [0, 48], sizes = [16, 16], strides = [1, 1]} : vector<16x64xf32> to vector<16x16xf32>
    %81 = vector.extract_strided_slice %11 {offsets = [0, 48], sizes = [16, 16], strides = [1, 1]} : vector<16x64xf32> to vector<16x16xf32>
    %82 = vector.extract_strided_slice %17 {offsets = [0, 48], sizes = [16, 16], strides = [1, 1]} : vector<16x64xf32> to vector<16x16xf32>
    %cst_40 = arith.constant dense<0.000000e+00> : vector<16x16xf32>
    %83 = tpu.matmul %80, %81, %cst_40 {dimension_numbers = #tpu.dot_dimension_numbers<[1], [1], [0], [0], [0, 0, 1, 0], [], []>} : vector<16x16xf32>, vector<16x16xf32>, vector<16x16xf32> -> vector<16x16xf32>
    %84 = arith.addf %83, %18 : vector<16x16xf32>
    %cst_41 = arith.constant dense<0xFF800000> : vector<16xf32>
    %85 = vector.multi_reduction <maximumf>, %84, %cst_41 [1] : vector<16x16xf32> to vector<16xf32>
    %86 = vector.shape_cast %85 : vector<16xf32> to vector<16x1xf32>
    %87 = vector.broadcast %86 : vector<16x1xf32> to vector<16x16xf32>
    %88 = arith.subf %84, %87 : vector<16x16xf32>
    %89 = math.exp %88 : vector<16x16xf32>
    %cst_42 = arith.constant dense<0.000000e+00> : vector<16xf32>
    %90 = vector.multi_reduction <add>, %89, %cst_42 [1] : vector<16x16xf32> to vector<16xf32>
    %91 = vector.shape_cast %90 : vector<16xf32> to vector<16x1xf32>
    %92 = tpu.reciprocal %91 {approx = true} : vector<16x1xf32> -> vector<16x1xf32>
    %93 = vector.broadcast %92 : vector<16x1xf32> to vector<16x16xf32>
    %94 = arith.mulf %89, %93 : vector<16x16xf32>
    %cst_43 = arith.constant dense<0.000000e+00> : vector<16x16xf32>
    %95 = tpu.matmul %94, %82, %cst_43 {dimension_numbers = #tpu.dot_dimension_numbers<[1], [0], [0], [1], [0, 0, 1, 1], [], []>} : vector<16x16xf32>, vector<16x16xf32>, vector<16x16xf32> -> vector<16x16xf32>
    %96 = vector.extract_strided_slice %19 {offsets = [48, 0], sizes = [16, 32], strides = [1, 1]} : vector<64x32xf32> to vector<16x32xf32>
    %cst_44 = arith.constant dense<0.000000e+00> : vector<16x32xf32>
    %97 = tpu.matmul %95, %96, %cst_44 {dimension_numbers = #tpu.dot_dimension_numbers<[1], [0], [0], [1], [0, 0, 1, 1], [], []>} : vector<16x16xf32>, vector<16x32xf32>, vector<16x32xf32> -> vector<16x32xf32>
    %98 = arith.addf %79, %97 : vector<16x32xf32>
    %cst_45 = arith.constant dense<0.000000e+00> : vector<16xf32>
    %99 = vector.multi_reduction <add>, %98, %cst_45 [1] : vector<16x32xf32> to vector<16xf32>
    %100 = vector.shape_cast %99 : vector<16xf32> to vector<16x1xf32>
    %cst_46 = arith.constant 3.200000e+01 : f32
    %101 = vector.broadcast %cst_46 : f32 to vector<16x1xf32>
    %102 = arith.divf %100, %101 : vector<16x1xf32>
    %103 = vector.broadcast %102 : vector<16x1xf32> to vector<16x32xf32>
    %104 = arith.subf %98, %103 : vector<16x32xf32>
    %105 = arith.mulf %104, %104 : vector<16x32xf32>
    %cst_47 = arith.constant dense<0.000000e+00> : vector<16xf32>
    %106 = vector.multi_reduction <add>, %105, %cst_47 [1] : vector<16x32xf32> to vector<16xf32>
    %107 = vector.shape_cast %106 : vector<16xf32> to vector<16x1xf32>
    %cst_48 = arith.constant 3.200000e+01 : f32
    %108 = vector.broadcast %cst_48 : f32 to vector<16x1xf32>
    %109 = arith.divf %107, %108 : vector<16x1xf32>
    %110 = vector.broadcast %102 : vector<16x1xf32> to vector<16x32xf32>
    %111 = arith.subf %98, %110 : vector<16x32xf32>
    %cst_49 = arith.constant 9.99999974E-6 : f32
    %112 = vector.broadcast %cst_49 : f32 to vector<16x1xf32>
    %113 = arith.addf %109, %112 : vector<16x1xf32>
    %114 = math.rsqrt %113 : vector<16x1xf32>
    %115 = vector.broadcast %114 : vector<16x1xf32> to vector<16x32xf32>
    %116 = arith.mulf %111, %115 : vector<16x32xf32>
    %c0_50 = arith.constant 0 : index
    %c0_51 = arith.constant 0 : index
    %117 = vector.load %arg12[%c0_50, %c0_51] : memref<1x32xf32, #tpu.memory_space<vmem>>, vector<1x32xf32>
    %118 = vector.broadcast %117 : vector<1x32xf32> to vector<16x32xf32>
    %119 = arith.mulf %116, %118 : vector<16x32xf32>
    %c0_52 = arith.constant 0 : index
    %c0_53 = arith.constant 0 : index
    %120 = vector.load %arg13[%c0_52, %c0_53] : memref<1x32xf32, #tpu.memory_space<vmem>>, vector<1x32xf32>
    %121 = vector.broadcast %120 : vector<1x32xf32> to vector<16x32xf32>
    %122 = arith.addf %119, %121 : vector<16x32xf32>
    %c0_54 = arith.constant 0 : index
    %c0_55 = arith.constant 0 : index
    %123 = vector.load %arg14[%c0_54, %c0_55] : memref<16x32xf32, #tpu.memory_space<vmem>>, vector<16x32xf32>
    tpu.vector_store %arg14[%c0_54, %c0_55], %122 {strides = array<i32>} : memref<16x32xf32, #tpu.memory_space<vmem>>, vector<16x32xf32>,
    return
  }
}

</mosaic_0001>

<bundles_post_ra>
// kernel: mha_forward.1
= control target key start
LH: loop header
LB: loop body
LE: loop exit
PB: predicated region body
PF: predicated region fallthrough
CT: control target
= control target key end

     0   :  { %vm61_vm0 = vcmask 261120   ;;  %s2161_s0 = inlined_call_operand.vmem [shape: f32[16,32], index: 0, kind: input, shape index: {}]   ;;  %s2162_s1 = inlined_call_operand.vmem [shape: f32[16,32], index: 1, kind: input, shape index: {}]   ;;  %s2163_s2 = inlined_call_operand.vmem [shape: f32[16,32], index: 2, kind: input, shape index: {}]   ;;  %s2164_s3 = inlined_call_operand.vmem [shape: f32[16,16], index: 3, kind: input, shape index: {}]   ;;  %s2165_s4 = inlined_call_operand.vmem [shape: f32[32,64], index: 4, kind: input, shape index: {}]   ;;  %s2166_s5 = inlined_call_operand.vmem [shape: f32[1,64], index: 5, kind: input, shape index: {}]   ;;  %s2167_s6 = inlined_call_operand.vmem [shape: f32[32,64], index: 6, kind: input, shape index: {}]   ;;  %s2168_s7 = inlined_call_operand.vmem [shape: f32[1,64], index: 7, kind: input, shape index: {}]   ;;  %s2169_s8 = inlined_call_operand.vmem [shape: f32[32,64], index: 8, kind: input, shape index: {}]   ;;  %s2170_s9 = inlined_call_operand.vmem [shape: f32[1,64], index: 9, kind: input, shape index: {}]   ;;  %s2171_s10 = inlined_call_operand.vmem [shape: f32[64,32], index: 10, kind: input, shape index: {}]   ;;  %s2172_s11 = inlined_call_operand.vmem [shape: f32[1,32], index: 11, kind: input, shape index: {}]   ;;  %s2173_s12 = inlined_call_operand.vmem [shape: f32[1,32], index: 12, kind: input, shape index: {}]   ;;  %s2174_s13 = inlined_call_operand.vmem [shape: f32[1,32], index: 13, kind: input, shape index: {}]   ;;  %s2175_s14 = inlined_call_operand.hbm [shape: f32[16,32], index: 14, kind: output, shape index: {}]  }
   0x1   :  { %v148_v0 = vld [vmem:[%s2167_s6 + $0x18] sm:$0xff]  ;;  %v147_v1 = vld [vmem:[%s2167_s6 + $0x10] sm:$0xff]  ;;  %v146_v4 = vld [vmem:[%s2167_s6 + $0x8] sm:$0xff] }
   0x2   :  { %v53_v2 = vld [vmem:[%s2165_s4 + $0x18] sm:$0xff]  ;;  %1659 = vmatprep.subr.mxu1 %v148_v0  ;;  %v52_v3 = vld [vmem:[%s2165_s4 + $0x10] sm:$0xff]  ;;  %v51_v5 = vld [vmem:[%s2165_s4 + $0x8] sm:$0xff] }
   0x3   :  { %1648 = vmatprep.subr.mxu0 %v53_v2  ;;  %1660 = vmatpush3.msra.mxu1 %v148_v0  ;;  %v143_v6 = vld [vmem:[%s2162_s1] sm:$0xff] }
   0x4   :  { %1649 = vmatpush3.msra.mxu0 %v53_v2  ;;  %1661 = vmatprep.subr.mxu1 %v147_v1  ;;  %v145_v7 = vld [vmem:[%s2167_s6] sm:$0xff] }
   0x5   :  { %1650 = vmatprep.subr.mxu0 %v52_v3  ;;  %1662 = vmatpush3.msra.mxu1 %v147_v1 }
   0x6   :  { %1651 = vmatpush3.msra.mxu0 %v52_v3 }
   0x7   :  { %19 = vsyncpa [#allocation3], 0  ;;  %1663 = vmatprep.subr.mxu1 %v146_v4  ;;  %1652 = vmatprep.subr.mxu0 %v51_v5  ;;  %v50_v8 = vld [vmem:[%s2165_s4] sm:$0xff]  ;;  %v144_v9 = vld [vmem:[%s2162_s1 + $0x8] sm:$0xff]  ;;  %vm350_vm1 = vcmask 130048   ;;  %s1831_s20 = smov 80  }
   0x8   :  { %1664 = vmatpush3.msra.mxu1 %v146_v4  ;;  %1667 = vmatprep.mubr.msk.f32.mxu1 %vm61_vm0, %v143_v6  ;;  %v1944_v10 = vld [vmem:[%s2161_s0] sm:$0xff]  ;;  %v1949_v11 = vld [vmem:[%s2161_s0 + $0x8] sm:$0xff]  ;;  %v242_v12 = vld [vmem:[%s2169_s8 + $0x18] sm:$0xff]  ;;  %s1832_s16 = smov [#allocation2]  }
   0x9   :  { %1665 = vmatprep.subr.mxu1 %v145_v7  ;;  %1653 = vmatpush3.msra.mxu0 %v51_v5  ;;  %v241_v13 = vld [vmem:[%s2169_s8 + $0x10] sm:$0xff]  ;;  %v237_v14 = vld [vmem:[%s2163_s2] sm:$0xff]  ;;  %v240_v15 = vld [vmem:[%s2169_s8 + $0x8] sm:$0xff]  ;;  %s1527_s17 = sshll.u32 %s1832_s16, 4  ;;  %s1528_s17 = int_to_ptr.vmem [resolvable:$true] %s1527_s17 }
   0xa   :  { %1666 = vmatpush3.msra.mxu1 %v145_v7  ;;  %1654 = vmatprep.subr.mxu0 %v50_v8  ;;  %v1541_v16 = vld [vmem:[%s2168_s7] ss:$0 sm:$0xff]  ;;  %v238_v20 = vld [vmem:[%s2163_s2 + $0x8] sm:$0xff]  ;;  %s1829_s2 = smov 112   ;;  %s1807_s18 = scalar_lea.vmem %s1528_s17, 256 }
   0xb   :  { %1668 = vmatmul.mubr.msk.f32.vlgmr.msra.gmra.mxu1 %vm61_vm0, %v144_v9  ;;  %1655 = vmatpush3.msra.mxu0 %v50_v8  ;;  %v239_v17 = vld [vmem:[%s2169_s8] sm:$0xff]  ;;  %v2014_v30 = vld [vmem:[%s2164_s3 + $0x8] sm:$0xff]  ;;  %p1808_p0 = scmp.ne.s32.totalorder %s1528_s17, %s1807_s18  ;;  %p1812_p1 = scmp.lt.s32.totalorder %s1528_s17, %s1528_s17 }
   0xc   :  { %1656 = vmatprep.mubr.msk.f32.mxu0 %vm61_vm0, %v1944_v10  ;;  %1670 = vmatprep.subr.mxu0 %v242_v12  ;;  %v1538_v23 = vld [vmem:[%s2166_s5] ss:$0 sm:$0xff]  ;;  %v334_v1 = vld [vmem:[%s2171_s10 + $0x8] sm:$0xff]  ;;  %p1813_p2 = scmp.lt.s32.totalorder %s1807_s18, %s1807_s18 }
   0xd   :  { %1657 = vmatmul.mubr.msk.f32.vlgmr.msra.gmra.mxu0 %vm61_vm0, %v1949_v11  ;;  %v2009_v29 = vld [vmem:[%s2164_s3] sm:$0xff]  ;;  %s1830_s3 = smov 96  }
   0xe   :  { %1671 = vmatpush3.msra.mxu0 %v242_v12  ;;  %1678 = vmatprep.mubr.msk.f32.mxu0 %vm61_vm0, %v237_v14  ;;  %v1544_v37 = vld [vmem:[%s2170_s9] ss:$0 sm:$0xff]  ;;  %p1814_p3 = por %p1813_p2, %p1812_p1 }
   0xf   :  { %1672 = vmatprep.subr.mxu0 %v241_v13  ;;  %v333_v2 = vld [vmem:[%s2171_s10] sm:$0xff] }
  0x10   :  { %1673 = vmatpush3.msra.mxu0 %v241_v13  ;;  %p1815_p4 = pnand %p1814_p3, %p1808_p0 }
  0x11   :  { %1674 = vmatprep.subr.mxu0 %v240_v15 }
  0x12   :  { %1675 = vmatpush3.msra.mxu0 %v240_v15 }
  0x13   :  { %1676 = vmatprep.subr.mxu0 %v239_v17 }
  0x14   :  { %1677 = vmatpush3.msra.mxu0 %v239_v17 }
  0x15   :  { %1679 = vmatmul.mubr.msk.f32.vlgmr.msra.gmra.mxu0 %vm61_vm0, %v238_v20 }
  0xcb   :  { %v1669_v18 = vpop.f32.mrf.mxu1 }
  0xcc   :  { %v1975_v19 = vadd.f32 %v1669_v18, %v1541_v16 }
  0xcd   :  { %v228_v21 = vpop.f32.mrf.mxu1  ;;  %v1658_v22 = vpop.f32.mrf.mxu0 }
  0xce   :  { %v1983_v24 = vadd.f32 %v1541_v16, %v228_v21  ;;  %1681 = vmatprep.subr.msk.mxu1 %vm350_vm1, %v1975_v19  ;;  %v2000_v27 = vadd.f32 %v1658_v22, %v1538_v23 }
  0xcf   :  { %1682 = vmatpush3.xpose.msk.msra.mxu1 %vm350_vm1, %v1975_v19  ;;  %v134_v25 = vpop.f32.mrf.mxu0 }
  0xd0   :  { %628 = vrot.lane.b32.xlu1 %v1983_v24, %s1829_s2  ;;  %v1992_v26 = vadd.f32 %v1538_v23, %v134_v25  ;;  %1683 = vmatprep.subr.msk.mxu1 %vm350_vm1, %v1983_v24 }
  0xd2   :  { %1685 = vmatprep.mubr.msk.f32.mxu1 %vm350_vm1, %v1992_v26 }
  0xd3   :  { %1684 = vmatpush3.xpose.msk.msra.mxu1 %vm350_vm1, %v1983_v24 }
  0xd4   :  { %624 = vrot.lane.b32.xlu1 %v1992_v26, %s1829_s2  ;;  %1695 = vmatprep.subr.mxu1 %v334_v1 }
  0xd5   :  { %v1680_v36 = vpop.f32.mrf.mxu0 }
  0xd6   :  { %1686 = vmatmul.mubr.msk.f32.vlgmr.msra.gmra.mxu1 %vm350_vm1, %v2000_v27  ;;  %v2023_v38 = vadd.f32 %v1680_v36, %v1544_v37 }
  0xd7   :  { %v322_v39 = vpop.f32.mrf.mxu0  ;;  %1696 = vmatpush3.msra.mxu1 %v334_v1 }
  0xd8   :  { %v2025_v40 = vadd.f32 %v1544_v37, %v322_v39  ;;  %1688 = vmatprep.subr.mxu0 %v2023_v38  ;;  %1697 = vmatprep.subr.mxu1 %v333_v2 }
  0xd9   :  { %1689 = vmatpush3.msra.mxu0 %v2023_v38  ;;  %1698 = vmatpush3.msra.mxu1 %v333_v2 }
  0xda   :  { %1690 = vmatprep.subr.mxu0 %v2025_v40 }
  0xdb   :  { %1691 = vmatpush3.msra.mxu0 %v2025_v40 }
 0x142   :  { %v629_v52 = vpop.permute.xlu1 %628 }
 0x146   :  { %v625_v53 = vpop.permute.xlu1 %624 }
 0x196   :  { %v1687_v28 = vpop.f32.mrf.mxu1 }
 0x197   :  { %v435_v33 = vadd.f32 %v1687_v28, %v2014_v30 }
 0x198   :  { %v429_v31 = vpop.f32.mrf.mxu1 }
 0x199   :  { %v430_v32 = vadd.f32 %v429_v31, %v2009_v29  ;;  %v441_v35 = vsel %vm350_vm1, %v435_v33, -inf }
 0x19b   :  { %v438_v34 = vsel %vm350_vm1, %v430_v32, -inf }
 0x19c   :  { %439 = vmax.xlane.f32.xlu0 %v438_v34 }
 0x1a0   :  { %442 = vmax.xlane.f32.xlu0 %v441_v35 }
 0x1b6   :  { %630 = vrot.lane.b32.xlu0 %v1975_v19, %s1829_s2 }
 0x1ba   :  { %915 = vrot.lane.b32.xlu0 %v1975_v19, %s1830_s3 }
 0x1be   :  { %909 = vrot.lane.b32.xlu0 %v1992_v26, %s1830_s3 }
 0x225   :  { %v440_v41 = vpop.xlane.xlu0 %439 }
 0x226   :  { %v444_v42 = vsub.f32 %v430_v32, %v440_v41 }
 0x228   :  { %v446_v45 = vmul.f32 1.442695, %v444_v42 }
 0x229   :  { %v443_v43 = vpop.xlane.xlu0 %442 }
 0x22a   :  { %v445_v44 = vsub.f32 %v435_v33, %v443_v43 }
 0x22c   :  { %v448_v46 = vmul.f32 1.442695, %v445_v44 }
 0x22d   :  { %v631_v47 = vpop.permute.xlu0 %630 }
 0x22e   :  { %1771 = vpow2.f32 %v448_v46  ;;  %1702 = vmatprep.subr.msk.mxu0 %vm350_vm1, %v631_v47 }
 0x22f   :  { %1773 = vpow2.f32 %v446_v45 }
 0x231   :  { %v916_v60 = vpop.permute.xlu0 %915 }
 0x235   :  { %v910_v62 = vpop.permute.xlu0 %909 }
 0x23b   :  { %v1772_v48 = vpop.eup %1771 }
 0x23c   :  { %v453_v49 = vsel %vm350_vm1, %v1772_v48, 0.0  ;;  %v1774_v50 = vpop.eup %1773 }
 0x23d   :  { %454 = vadd.xlane.f32.xlu1 %v453_v49  ;;  %v450_v51 = vsel %vm350_vm1, %v1774_v50, 0.0 }
 0x241   :  { %451 = vadd.xlane.f32.xlu1 %v450_v51 }
 0x252   :  { %626 = vrot.lane.b32.xlu1 %v2000_v27, %s1829_s2 }
 0x256   :  { %913 = vrot.lane.b32.xlu1 %v1983_v24, %s1830_s3 }
 0x25a   :  { %911 = vrot.lane.b32.xlu1 %v2000_v27, %s1830_s3 }
 0x2c6   :  { %v455_v54 = vpop.xlane.xlu1 %454 }
 0x2c7   :  { %1775 = vrcp.f32 %v455_v54 }
 0x2ca   :  { %v452_v55 = vpop.xlane.xlu1 %451 }
 0x2cb   :  { %1777 = vrcp.f32 %v452_v55  ;;  %v336_v55 = vld [vmem:[%s2171_s10 + $0x18] sm:$0xff] }
 0x2ce   :  { %v627_v61 = vpop.permute.xlu1 %626 }
 0x2d2   :  { %v914_v63 = vpop.permute.xlu1 %913 }
 0x2d4   :  { %v1776_v56 = vpop.eup %1775 }
 0x2d5   :  { %v459_v59 = vmul.f32 %v1776_v56, %v1772_v48  ;;  %v335_v56 = vld [vmem:[%s2171_s10 + $0x10] sm:$0xff] }
 0x2d6   :  { %v912_v0 = vpop.permute.xlu1 %911 }
 0x2d8   :  { %v1778_v57 = vpop.eup %1777 }
 0x2d9   :  { %v458_v58 = vmul.f32 %v1778_v57, %v1774_v50 }
 0x2db   :  { %1692 = vmatprep.mubr.msk.f32.mxu0 %vm350_vm1, %v458_v58 }
 0x2dc   :  { %1693 = vmatmul.mubr.msk.f32.vlgmr.msra.gmra.mxu0 %vm350_vm1, %v459_v59 }
 0x2dd   :  { %1703 = vmatpush3.xpose.msk.msra.mxu0 %vm350_vm1, %v631_v47  ;;  %1706 = vmatprep.mubr.msk.f32.mxu0 %vm350_vm1, %v625_v53 }
 0x2de   :  { %1704 = vmatprep.subr.msk.mxu0 %vm350_vm1, %v629_v52 }
 0x2e1   :  { %1705 = vmatpush3.xpose.msk.msra.mxu0 %vm350_vm1, %v629_v52 }
 0x2e2   :  { %1723 = vmatprep.subr.msk.mxu0 %vm350_vm1, %v916_v60 }
 0x2e4   :  { %1707 = vmatmul.mubr.msk.f32.vlgmr.msra.gmra.mxu0 %vm350_vm1, %v627_v61 }
 0x2e5   :  { %1724 = vmatpush3.xpose.msk.msra.mxu0 %vm350_vm1, %v916_v60  ;;  %1727 = vmatprep.mubr.msk.f32.mxu0 %vm350_vm1, %v910_v62 }
 0x2e6   :  { %1725 = vmatprep.subr.msk.mxu0 %vm350_vm1, %v914_v63 }
 0x2e9   :  { %1726 = vmatpush3.xpose.msk.msra.mxu0 %vm350_vm1, %v914_v63 }
 0x2ec   :  { %1728 = vmatmul.mubr.msk.f32.vlgmr.msra.gmra.mxu0 %vm350_vm1, %v912_v0 }
 0x39c   :  { %v1694_v3 = vpop.f32.mrf.mxu0 }
 0x39e   :  { %v532_v4 = vpop.f32.mrf.mxu0 }
 0x39f   :  { %1699 = vmatprep.mubr.msk.f32.mxu1 %vm350_vm1, %v532_v4 }
 0x3a0   :  { %1700 = vmatmul.mubr.msk.f32.vlgmr.msra.gmra.mxu1 %vm350_vm1, %v1694_v3 }
 0x3a4   :  { %v1708_v5 = vpop.f32.mrf.mxu0 }
 0x3a5   :  { %v712_v6 = vadd.f32 %v1708_v5, %v2014_v30 }
 0x3a6   :  { %v706_v7 = vpop.f32.mrf.mxu0 }
 0x3a7   :  { %v707_v8 = vadd.f32 %v706_v7, %v2009_v29  ;;  %v718_v9 = vsel %vm350_vm1, %v712_v6, -inf }
 0x3a8   :  { %719 = vmax.xlane.f32.xlu1 %v718_v9  ;;  %v338_v9 = vld [vmem:[%s2171_s10 + $0x28] sm:$0xff] }
 0x3a9   :  { %v715_v12 = vsel %vm350_vm1, %v707_v8, -inf }
 0x3aa   :  { %716 = vmax.xlane.f32.xlu0 %v715_v12  ;;  %v337_v12 = vld [vmem:[%s2171_s10 + $0x20] sm:$0xff] }
 0x3ac   :  { %v1729_v13 = vpop.f32.mrf.mxu0 }
 0x3ad   :  { %v997_v14 = vadd.f32 %v1729_v13, %v2014_v30 }
 0x3ae   :  { %v991_v36 = vpop.f32.mrf.mxu0 }
 0x3af   :  { %v1003_v15 = vsel %vm350_vm1, %v997_v14, -inf  ;;  %v992_v37 = vadd.f32 %v991_v36, %v2009_v29 }
 0x3b1   :  { %v1000_v39 = vsel %vm350_vm1, %v992_v37, -inf }
 0x3b9   :  { %739 = vrot.lane.b32.xlu1 %v2025_v40, %s1829_s2 }
 0x3bd   :  { %1198 = vrot.lane.b32.xlu1 %v1975_v19, %s1831_s20 }
 0x3c1   :  { %1196 = vrot.lane.b32.xlu1 %v1983_v24, %s1831_s20 }
 0x3c5   :  { %1194 = vrot.lane.b32.xlu1 %v2000_v27, %s1831_s20 }
 0x3e9   :  { %1004 = vmax.xlane.f32.xlu1 %v1003_v15 }
 0x3fa   :  { %1022 = vrot.lane.b32.xlu1 %v2025_v40, %s1830_s3 }
 0x431   :  { %v720_v16 = vpop.xlane.xlu1 %719 }
 0x432   :  { %v722_v17 = vsub.f32 %v712_v6, %v720_v16 }
 0x433   :  { %v717_v18 = vpop.xlane.xlu0 %716 }
 0x434   :  { %v725_v20 = vmul.f32 1.442695, %v722_v17  ;;  %v721_v19 = vsub.f32 %v707_v8, %v717_v18 }
 0x435   :  { %v740_v21 = vpop.permute.xlu1 %739 }
 0x436   :  { %1779 = vpow2.f32 %v725_v20  ;;  %v723_v22 = vmul.f32 1.442695, %v721_v19 }
 0x438   :  { %1781 = vpow2.f32 %v723_v22 }
 0x439   :  { %v1199_v23 = vpop.permute.xlu1 %1198 }
 0x43a   :  { %1744 = vmatprep.subr.msk.mxu0 %vm350_vm1, %v1199_v23 }
 0x43b   :  { %1745 = vmatpush3.xpose.msk.msra.mxu0 %vm350_vm1, %v1199_v23  ;;  %v1547_v23 = vld [vmem:[%s2172_s11] ss:$0 sm:$0xff] }
 0x43d   :  { %v1197_v24 = vpop.permute.xlu1 %1196 }
 0x43e   :  { %1746 = vmatprep.subr.msk.mxu0 %vm350_vm1, %v1197_v24 }
 0x43f   :  { %1747 = vmatpush3.xpose.msk.msra.mxu0 %vm350_vm1, %v1197_v24  ;;  %v349_v24 = vadd.f32 %v1547_v23, %v1949_v11 }
 0x441   :  { %v1195_v32 = vpop.permute.xlu1 %1194 }
 0x443   :  { %v1780_v25 = vpop.eup %1779 }
 0x444   :  { %v730_v27 = vsel %vm350_vm1, %v1780_v25, 0.0 }
 0x445   :  { %v1782_v28 = vpop.eup %1781  ;;  %731 = vadd.xlane.f32.xlu0 %v730_v27 }
 0x446   :  { %v727_v31 = vsel %vm350_vm1, %v1782_v28, 0.0 }
 0x449   :  { %728 = vadd.xlane.f32.xlu0 %v727_v31 }
 0x45f   :  { %741 = vrot.lane.b32.xlu0 %v2023_v38, %s1829_s2 }
 0x460   :  { %v1701_v59 = vpop.f32.mrf.mxu1 }
 0x461   :  { %v623_v27 = vadd.f32 %v1701_v59, %v349_v24 }
 0x462   :  { %v613_v0 = vpop.f32.mrf.mxu1 }
 0x463   :  { %1192 = vrot.lane.b32.xlu0 %v1992_v26, %s1831_s20 }
 0x472   :  { %v1005_v33 = vpop.xlane.xlu1 %1004 }
 0x473   :  { %v1007_v34 = vsub.f32 %v997_v14, %v1005_v33 }
 0x475   :  { %v1010_v35 = vmul.f32 1.442695, %v1007_v34 }
 0x477   :  { %1783 = vpow2.f32 %v1010_v35 }
 0x482   :  { %1001 = vmax.xlane.f32.xlu0 %v1000_v39 }
 0x484   :  { %v1784_v41 = vpop.eup %1783 }
 0x485   :  { %v1015_v42 = vsel %vm350_vm1, %v1784_v41, 0.0 }
 0x486   :  { %1016 = vadd.xlane.f32.xlu0 %v1015_v42 }
 0x4ce   :  { %v732_v43 = vpop.xlane.xlu0 %731 }
 0x4cf   :  { %1785 = vrcp.f32 %v732_v43 }
 0x4d2   :  { %v729_v44 = vpop.xlane.xlu0 %728 }
 0x4d3   :  { %1787 = vrcp.f32 %v729_v44  ;;  %v339_v44 = vld [vmem:[%s2171_s10 + $0x30] sm:$0xff] }
 0x4d6   :  { %v742_v26 = vpop.permute.xlu0 %741 }
 0x4d7   :  { %1709 = vmatprep.subr.mxu1 %v742_v26 }
 0x4d8   :  { %1710 = vmatpush3.msra.mxu1 %v742_v26 }
 0x4d9   :  { %1711 = vmatprep.subr.mxu1 %v740_v21 }
 0x4da   :  { %1712 = vmatpush3.msra.mxu1 %v740_v21  ;;  %v1193_v45 = vpop.permute.xlu0 %1192 }
 0x4db   :  { %1748 = vmatprep.mubr.msk.f32.mxu0 %vm350_vm1, %v1193_v45  ;;  %1716 = vmatprep.subr.mxu1 %v336_v55 }
 0x4dc   :  { %1749 = vmatmul.mubr.msk.f32.vlgmr.msra.gmra.mxu0 %vm350_vm1, %v1195_v32  ;;  %v1786_v46 = vpop.eup %1785 }
 0x4dd   :  { %v736_v49 = vmul.f32 %v1786_v46, %v1780_v25  ;;  %v348_v25 = vadd.f32 %v1547_v23, %v1944_v10  ;;  %v340_v10 = vld [vmem:[%s2171_s10 + $0x38] sm:$0xff] }
 0x4df   :  { %v622_v31 = vadd.f32 %v613_v0, %v348_v25 }
 0x4e0   :  { %v1788_v47 = vpop.eup %1787 }
 0x4e1   :  { %v735_v48 = vmul.f32 %v1788_v47, %v1782_v28 }
 0x4e3   :  { %1713 = vmatprep.mubr.msk.f32.mxu1 %vm350_vm1, %v735_v48 }
 0x4e4   :  { %1714 = vmatmul.mubr.msk.f32.vlgmr.msra.gmra.mxu1 %vm350_vm1, %v736_v49 }
 0x4e5   :  { %1717 = vmatpush3.msra.mxu1 %v336_v55 }
 0x4e6   :  { %1718 = vmatprep.subr.mxu1 %v335_v56 }
 0x4e7   :  { %1719 = vmatpush3.msra.mxu1 %v335_v56 }
 0x50b   :  { %v1002_v50 = vpop.xlane.xlu0 %1001 }
 0x50c   :  { %v1006_v51 = vsub.f32 %v992_v37, %v1002_v50 }
 0x50e   :  { %v1008_v52 = vmul.f32 1.442695, %v1006_v51 }
 0x50f   :  { %v1017_v1 = vpop.xlane.xlu0 %1016 }
 0x510   :  { %1789 = vpow2.f32 %v1008_v52 }
 0x511   :  { %1791 = vrcp.f32 %v1017_v1 }
 0x51d   :  { %v1790_v53 = vpop.eup %1789 }
 0x51e   :  { %v1012_v54 = vsel %vm350_vm1, %v1790_v53, 0.0  ;;  %v1792_v5 = vpop.eup %1791 }
 0x51f   :  { %1013 = vadd.xlane.f32.xlu0 %v1012_v54  ;;  %v1021_v8 = vmul.f32 %v1792_v5, %v1784_v41 }
 0x535   :  { %1024 = vrot.lane.b32.xlu0 %v2023_v38, %s1830_s3 }
 0x59c   :  { %v1750_v57 = vpop.f32.mrf.mxu0 }
 0x59d   :  { %v1280_v58 = vadd.f32 %v1750_v57, %v2014_v30 }
 0x59e   :  { %v1274_v60 = vpop.f32.mrf.mxu0 }
 0x59f   :  { %v1275_v61 = vadd.f32 %v1274_v60, %v2009_v29  ;;  %v1286_v62 = vsel %vm350_vm1, %v1280_v58, -inf  ;;  %v1023_v29 = vpop.permute.xlu1 %1022 }
 0x5a0   :  { %1287 = vmax.xlane.f32.xlu0 %v1286_v62 }
 0x5a1   :  { %v1283_v63 = vsel %vm350_vm1, %v1275_v61, -inf }
 0x5a2   :  { %1284 = vmax.xlane.f32.xlu1 %v1283_v63 }
 0x5a4   :  { %v1715_v2 = vpop.f32.mrf.mxu1 }
 0x5a6   :  { %v817_v3 = vpop.f32.mrf.mxu1 }
 0x5a7   :  { %1720 = vmatprep.mubr.msk.f32.mxu1 %vm350_vm1, %v817_v3 }
 0x5a8   :  { %1721 = vmatmul.mubr.msk.f32.vlgmr.msra.gmra.mxu1 %vm350_vm1, %v1715_v2  ;;  %v1014_v30 = vpop.xlane.xlu0 %1013 }
 0x5a9   :  { %1793 = vrcp.f32 %v1014_v30 }
 0x5ac   :  { %v1025_v4 = vpop.permute.xlu0 %1024 }
 0x5ad   :  { %1730 = vmatprep.subr.mxu1 %v1025_v4 }
 0x5ae   :  { %1731 = vmatpush3.msra.mxu1 %v1025_v4 }
 0x5af   :  { %1732 = vmatprep.subr.mxu1 %v1023_v29 }
 0x5b0   :  { %1733 = vmatpush3.msra.mxu1 %v1023_v29 }
 0x5b1   :  { %1737 = vmatprep.subr.mxu1 %v338_v9 }
 0x5b6   :  { %v1794_v6 = vpop.eup %1793 }
 0x5b7   :  { %v1020_v7 = vmul.f32 %v1794_v6, %v1790_v53 }
 0x5b9   :  { %1734 = vmatprep.mubr.msk.f32.mxu1 %vm350_vm1, %v1020_v7  ;;  %v1580_v7 = vld [vmem:[%s2173_s12] ss:$0 sm:$0xff] }
 0x5ba   :  { %1735 = vmatmul.mubr.msk.f32.vlgmr.msra.gmra.mxu1 %vm350_vm1, %v1021_v8 }
 0x5bb   :  { %1738 = vmatpush3.msra.mxu1 %v338_v9 }
 0x5bc   :  { %1739 = vmatprep.subr.mxu1 %v337_v12 }
 0x5bd   :  { %1740 = vmatpush3.msra.mxu1 %v337_v12  ;;  %v1581_v12 = vld [vmem:[%s2174_s13] ss:$0 sm:$0xff] }
 0x629   :  { %v1288_v13 = vpop.xlane.xlu0 %1287 }
 0x62a   :  { %v1290_v14 = vsub.f32 %v1280_v58, %v1288_v13 }
 0x62b   :  { %v1285_v15 = vpop.xlane.xlu1 %1284 }
 0x62c   :  { %v1293_v16 = vmul.f32 1.442695, %v1290_v14  ;;  %v1289_v17 = vsub.f32 %v1275_v61, %v1285_v15 }
 0x62e   :  { %1795 = vpow2.f32 %v1293_v16  ;;  %v1291_v18 = vmul.f32 1.442695, %v1289_v17 }
 0x630   :  { %1797 = vpow2.f32 %v1291_v18 }
 0x63b   :  { %v1796_v20 = vpop.eup %1795 }
 0x63c   :  { %v1298_v19 = vsel %vm350_vm1, %v1796_v20, 0.0 }
 0x63d   :  { %v1798_v21 = vpop.eup %1797  ;;  %1299 = vadd.xlane.f32.xlu1 %v1298_v19 }
 0x63e   :  { %v1295_v22 = vsel %vm350_vm1, %v1798_v21, 0.0 }
 0x63f   :  { %1296 = vadd.xlane.f32.xlu0 %v1295_v22 }
 0x64e   :  { %1305 = vrot.lane.b32.xlu1 %v2025_v40, %s1831_s20 }
 0x655   :  { %1307 = vrot.lane.b32.xlu0 %v2023_v38, %s1831_s20 }
 0x668   :  { %v1722_v28 = vpop.f32.mrf.mxu1 }
 0x669   :  { %v908_v32 = vadd.f32 %v1722_v28, %v623_v27 }
 0x66a   :  { %v898_v33 = vpop.f32.mrf.mxu1 }
 0x66b   :  { %v907_v34 = vadd.f32 %v898_v33, %v622_v31 }
 0x67a   :  { %v1736_v35 = vpop.f32.mrf.mxu1 }
 0x67c   :  { %v1100_v36 = vpop.f32.mrf.mxu1 }
 0x67d   :  { %1741 = vmatprep.mubr.msk.f32.mxu1 %vm350_vm1, %v1100_v36 }
 0x67e   :  { %1742 = vmatmul.mubr.msk.f32.vlgmr.msra.gmra.mxu1 %vm350_vm1, %v1736_v35 }
 0x6c6   :  { %v1300_v38 = vpop.xlane.xlu1 %1299 }
 0x6c7   :  { %1799 = vrcp.f32 %v1300_v38 }
 0x6c8   :  { %v1297_v40 = vpop.xlane.xlu0 %1296 }
 0x6c9   :  { %1801 = vrcp.f32 %v1297_v40 }
 0x6ca   :  { %v1306_v11 = vpop.permute.xlu1 %1305 }
 0x6cc   :  { %v1308_v37 = vpop.permute.xlu0 %1307 }
 0x6cd   :  { %1751 = vmatprep.subr.mxu1 %v1308_v37 }
 0x6ce   :  { %1752 = vmatpush3.msra.mxu1 %v1308_v37 }
 0x6cf   :  { %1753 = vmatprep.subr.mxu1 %v1306_v11 }
 0x6d0   :  { %1754 = vmatpush3.msra.mxu1 %v1306_v11 }
 0x6d1   :  { %1758 = vmatprep.subr.mxu1 %v340_v10 }
 0x6d4   :  { %v1800_v39 = vpop.eup %1799 }
 0x6d5   :  { %v1304_v43 = vmul.f32 %v1800_v39, %v1796_v20 }
 0x6d6   :  { %v1802_v41 = vpop.eup %1801 }
 0x6d7   :  { %v1303_v42 = vmul.f32 %v1802_v41, %v1798_v21 }
 0x6d9   :  { %1755 = vmatprep.mubr.msk.f32.mxu1 %vm350_vm1, %v1303_v42 }
 0x6da   :  { %1756 = vmatmul.mubr.msk.f32.vlgmr.msra.gmra.mxu1 %vm350_vm1, %v1304_v43 }
 0x6db   :  { %1759 = vmatpush3.msra.mxu1 %v340_v10 }
 0x6dc   :  { %1760 = vmatprep.subr.mxu1 %v339_v44 }
 0x6dd   :  { %1761 = vmatpush3.msra.mxu1 %v339_v44 }
 0x73e   :  { %v1743_v26 = vpop.f32.mrf.mxu1 }
 0x73f   :  { %v1191_v45 = vadd.f32 %v1743_v26, %v908_v32 }
 0x740   :  { %v1181_v46 = vpop.f32.mrf.mxu1 }
 0x741   :  { %v1190_v50 = vadd.f32 %v1181_v46, %v907_v34 }
 0x79a   :  { %v1757_v47 = vpop.f32.mrf.mxu1 }
 0x79c   :  { %v1383_v48 = vpop.f32.mrf.mxu1 }
 0x79d   :  { %1762 = vmatprep.mubr.msk.f32.mxu1 %vm350_vm1, %v1383_v48 }
 0x79e   :  { %1763 = vmatmul.mubr.msk.f32.vlgmr.msra.gmra.mxu1 %vm350_vm1, %v1757_v47 }
 0x85e   :  { %v1764_v49 = vpop.f32.mrf.mxu1 }
 0x85f   :  { %v1474_v51 = vadd.f32 %v1764_v49, %v1191_v45 }
 0x860   :  { %v1464_v52 = vpop.f32.mrf.mxu1 }
 0x861   :  { %v1473_v53 = vadd.f32 %v1464_v52, %v1190_v50  ;;  %v1478_v54 = vsel %vm61_vm0, %v1474_v51, 0.0 }
 0x862   :  { %1479 = vadd.xlane.f32.xlu0 %v1478_v54 }
 0x863   :  { %v1475_v55 = vsel %vm61_vm0, %v1473_v53, 0.0 }
 0x864   :  { %1476 = vadd.xlane.f32.xlu1 %v1475_v55 }
 0x8eb   :  { %v1480_v56 = vpop.xlane.xlu0 %1479 }
 0x8ec   :  { %v1483_v57 = vmul.f32 0.03125, %v1480_v56 }
 0x8ed   :  { %v1477_v58 = vpop.xlane.xlu1 %1476 }
 0x8ee   :  { %v1485_v59 = vsub.f32 %v1474_v51, %v1483_v57  ;;  %v1482_v60 = vmul.f32 0.03125, %v1477_v58 }
 0x8f0   :  { %v1484_v61 = vsub.f32 %v1473_v53, %v1482_v60  ;;  %v1487_v62 = vmul.f32 %v1485_v59, %v1485_v59 }
 0x8f2   :  { %v1491_v63 = vsel %vm61_vm0, %v1487_v62, 0.0  ;;  %v1486_v0 = vmul.f32 %v1484_v61, %v1484_v61 }
 0x8f3   :  { %1492 = vadd.xlane.f32.xlu1 %v1491_v63 }
 0x8f4   :  { %v1488_v1 = vsel %vm61_vm0, %v1486_v0, 0.0 }
 0x8f5   :  { %1489 = vadd.xlane.f32.xlu0 %v1488_v1 }
 0x97c   :  { %v1493_v2 = vpop.xlane.xlu1 %1492 }
 0x97d   :  { %v1495_v3 = vmul.f32 0.03125, %v1493_v2 }
 0x97e   :  { %v1490_v30 = vpop.xlane.xlu0 %1489 }
 0x97f   :  { %v1497_v4 = vadd.f32 1e-05, %v1495_v3  ;;  %v1494_v29 = vmul.f32 0.03125, %v1490_v30 }
 0x981   :  { %1803 = vrsqrt.f32 %v1497_v4  ;;  %v1496_v5 = vadd.f32 1e-05, %v1494_v29 }
 0x983   :  { %1805 = vrsqrt.f32 %v1496_v5 }
 0x98e   :  { %v1804_v6 = vpop.eup %1803 }
 0x98f   :  { %v1501_v8 = vmul.f32 %v1804_v6, %v1485_v59 }
 0x990   :  { %v1806_v9 = vpop.eup %1805 }
 0x991   :  { %v1500_v13 = vmul.f32 %v1806_v9, %v1484_v61  ;;  %v1510_v14 = vmul.f32 %v1580_v7, %v1501_v8 }
 0x993   :  { %v1509_v15 = vmul.f32 %v1580_v7, %v1500_v13  ;;  %v1519_v16 = vadd.f32 %v1581_v12, %v1510_v14 }
 0x995   :  { %v1518_v17 = vadd.f32 %v1581_v12, %v1509_v15  ;;  %1521 = vst.msk [vmem:[#allocation2 + $0x8] sm:$0xff] %vm61_vm0, %v1519_v16 }
 0x997   :  { %1520 = vst.msk [vmem:[#allocation2] sm:$0xff] %vm61_vm0, %v1518_v17 }
 0x998   :  { %1818 = shalt.err (!%p1815_p4)
}
 0x999   :  { %s1833_s12 = smov 128   ;;  %s1834_s13 = smov 8  }
 0x99a   :  { %1533 = dma.vmem_to_hbm [thread:$0]  %s1528_s17, 256, %s2175_s14, [#allocation3], %s1833_s12, %s1833_s12, %s1834_s13  }
 0x99b   :  { %1827 = dma.done.wait [#allocation3], 256  }
 0x99c   :  { %1828 = vsyncadd [#allocation3], 4294967040 }
 0x99d   :  { %1537 = vsyncpa [#allocation3], 1 }

</bundles_post_ra>
